<compile_context>
chip_gen: v5e
topology: v5e:2x2
jax: 0.10.0
libtpu: 0.0.40
codegen_flags: <defaults>
</compile_context>

<pallas_src>
import functools

import jax
import jax.numpy as jnp
from jax.experimental import pallas as pl
from jax.experimental.pallas import tpu as pltpu

EPS = 1e-5


def _dds_conv_kernel(*refs, kernel_size, dilation, pad, halo, t_tile,
                     has_g, approximate_gelu, matmul_bf16, elementwise_bf16):
    if has_g:
        (xc_ref, xl_ref, xr_ref, gc_ref, gl_ref, gr_ref,
         wdw_ref, wpw_ref, vec_ref, o_ref) = refs
    else:
        (xc_ref, xl_ref, xr_ref,
         wdw_ref, wpw_ref, vec_ref, o_ref) = refs
        gc_ref = gl_ref = gr_ref = None

    f32 = jnp.float32
    cd = jnp.bfloat16 if elementwise_bf16 else f32   # elementwise compute dtype

    # ---- load tile + halos, fuse the conditioning add (x = x + g) ----
    xc = xc_ref[0].astype(f32)           # (C, t_tile)  centre tile
    xl = xl_ref[0].astype(f32)           # (C, halo)    tail of previous tile
    xr = xr_ref[0].astype(f32)           # (C, halo)    head of next tile
    if has_g:
        xc = xc + gc_ref[0].astype(f32)
        xl = xl + gl_ref[0].astype(f32)
        xr = xr + gr_ref[0].astype(f32)

    # Zero the halos at the sequence boundaries ('same' zero padding).
    # Use a select, not arithmetic masking, so NaN/Inf in the clamped
    # duplicate boundary fetch cannot propagate into the padded region.
    t = pl.program_id(1)
    last = pl.num_programs(1) - 1
    xl = jnp.where(jnp.full(xl.shape, t, jnp.int32) > 0, xl, 0.0)
    xr = jnp.where(jnp.full(xr.shape, t, jnp.int32) < last, xr, 0.0)

    # ---- packed per-channel vectors ----
    vec = vec_ref[...].astype(f32)       # (C, 8)
    b_dw, gamma1, beta1 = vec[:, 0:1], vec[:, 1:2], vec[:, 2:3]
    b_pw, gamma2, beta2 = vec[:, 3:4], vec[:, 4:5], vec[:, 5:6]

    # ---- depthwise dilated conv (groups == channels) ----
    # Tap at signed lane offset d relative to the centre tile, assembled from
    # value slices of (xl | xc | xr); the aligned centre tap (d == 0) is xc.
    def tap(d):
        if d == 0:
            return xc
        if d < 0:
            dd = -d
            if dd >= t_tile:                      # only when halo == t_tile
                return xl
            return jnp.concatenate([xl[:, halo - dd:], xc[:, :t_tile - dd]],
                                   axis=1)
        if d >= t_tile:                           # only when halo == t_tile
            return xr
        return jnp.concatenate([xc[:, d:], xr[:, :d]], axis=1)

    w_dw = wdw_ref[...].astype(f32)      # (C, K)
    y = jnp.zeros_like(xc)
    for k in range(kernel_size):         # small static unroll
        y = y + w_dw[:, k:k + 1] * tap(k * dilation - pad)
    y = y + b_dw

    # ---- LayerNorm over channels -> GELU ----
    def ln_gelu(z, gamma, beta):
        zf = z.astype(f32)
        mean = jnp.mean(zf, axis=0, keepdims=True)
        # E[z^2] - mean^2: the two sublane reductions are independent and the
        # full-tile (z - mean)^2 pre-pass disappears.
        var = jnp.mean(zf * zf, axis=0, keepdims=True) - mean * mean
        inv = jax.lax.rsqrt(var + EPS)
        norm = ((z.astype(cd) - mean.astype(cd)) * inv.astype(cd)
                * gamma.astype(cd) + beta.astype(cd))
        # approximate=True -> tanh GELU on the EUP instead of an erf VPU poly.
        return jax.nn.gelu(norm, approximate=approximate_gelu)

    y = ln_gelu(y, gamma1, beta1)

    # ---- pointwise 1x1 conv == (C,C) @ (C, t_tile) matmul + bias ----
    w_pw = wpw_ref[...]                  # bf16 (host-cast) or f32
    if matmul_bf16:
        y = jnp.dot(w_pw, y.astype(jnp.bfloat16), preferred_element_type=f32)
    else:
        y = jnp.dot(w_pw.astype(f32), y.astype(f32), preferred_element_type=f32)
    y = y + b_pw

    y = ln_gelu(y, gamma2, beta2)

    # ---- residual (xc already includes g) ----
    o_ref[0] = (xc + y.astype(f32)).astype(o_ref.dtype)


def _vmem_bytes(C, t_tile, halo, itemsize, has_g, kernel_size):
    """Rough double-buffered VMEM footprint estimate for one grid step."""
    n_stream = 2 if has_g else 1
    per_in = C * (t_tile + 2 * halo) * itemsize
    io = 2 * (n_stream * per_in + C * t_tile * itemsize)     # double-buffered
    weights = 2 * 4 * (C * kernel_size + C * C + 8 * C)
    work = 6 * C * t_tile * 4                                # f32 intermediates
    return io + weights + work


def _choose_tile(T_pad, halo, B, C, itemsize, has_g, kernel_size):
    """Pick the time-tile size (multiple of `halo`, divisor of T_pad)."""
    cands = [c for c in range(halo, T_pad + 1, halo) if T_pad % c == 0]
    budget = 24 * 1024 * 1024
    fit = [c for c in cands
           if _vmem_bytes(C, c, halo, itemsize, has_g, kernel_size) <= budget]
    if not fit:
        fit = [cands[0]]
    # Prefer the largest tile that still leaves >= 8 grid steps (pipeline
    # depth; ~4 steps per TensorCore under v7x megacore sharding), but never
    # shrink below 512 lanes for depth alone (halo over-read grows as tiles
    # shrink). Otherwise take the largest tile that fits VMEM.
    deep = [c for c in fit if c >= 512 and B * (T_pad // c) >= 8]
    return max(deep) if deep else max(fit)


def dds_conv_layer(x, params, *, index: int, kernel_size: int, g=None,
                   approximate_gelu: bool = True, matmul_bf16=None,
                   elementwise_bf16: bool = False):
    """x: [B, C, T]. params: dict of weights. g: optional [B, C, T].

    approximate_gelu: tanh GELU on the EUP (default True; set False for the
        module's exact-erf forward).
    matmul_bf16: bf16 MXU matmul with f32 accumulation (default: C >= 512).
    elementwise_bf16: do the LN-normalize/scale/GELU chain in bf16 (stats and
        matmul accumulation stay f32). Worth it on bf16-native v6e/v7x VPUs;
        keep False on v5e.
    """
    B, C, T = x.shape
    dilation = kernel_size ** index
    pad = (kernel_size * dilation - dilation) // 2
    # 'same' output length requires dilation*(K-1) even (true for odd K).
    assert (kernel_size - 1) * dilation % 2 == 0, "non-'same' conv unsupported"
    if matmul_bf16 is None:
        matmul_bf16 = C >= 512
    has_g = g is not None
    itemsize = jnp.dtype(x.dtype).itemsize

    # Halo: 128-lane-aligned blocks wide enough to cover the 'same' padding.
    halo = 128 * max(1, -(-pad // 128))
    # Host-pad T to a multiple of the halo block so the lane-dense tiled path
    # is always used; padded tail positions are computed then sliced off.
    T_pad = -(-T // halo) * halo
    t_tile = _choose_tile(T_pad, halo, B, C, itemsize, has_g, kernel_size)
    nT = T_pad // t_tile
    r = t_tile // halo
    n_halo_blocks = T_pad // halo

    if T_pad != T:
        zp = ((0, 0), (0, 0), (0, T_pad - T))
        x_in = jnp.pad(x, zp)
        g_in = jnp.pad(g, zp) if has_g else None
    else:
        x_in, g_in = x, g

    # ---- weights (VMEM-resident; six per-channel vectors packed to (C,8)) --
    w_dw = params["w_dw"].reshape(C, kernel_size).astype(jnp.float32)
    w_pw = params["w_pw"].reshape(C, C).astype(
        jnp.bfloat16 if matmul_bf16 else jnp.float32)      # host-side cast
    col = lambda n: params[n].reshape(C, 1).astype(jnp.float32)
    vecs = jnp.concatenate(
        [col("b_dw"), col("gamma1"), col("beta1"),
         col("b_pw"), col("gamma2"), col("beta2"),
         jnp.zeros((C, 2), jnp.float32)], axis=1)          # (C, 8) packed

    center_spec = pl.BlockSpec((1, C, t_tile), lambda b, t: (b, 0, t))
    left_spec = pl.BlockSpec(
        (1, C, halo), lambda b, t: (b, 0, jnp.maximum(t * r - 1, 0)))
    right_spec = pl.BlockSpec(
        (1, C, halo),
        lambda b, t: (b, 0, jnp.minimum((t + 1) * r, n_halo_blocks - 1)))
    whole = lambda b, t: (0, 0)

    in_specs = [center_spec, left_spec, right_spec]
    operands = [x_in, x_in, x_in]
    if has_g:
        in_specs += [center_spec, left_spec, right_spec]
        operands += [g_in, g_in, g_in]
    in_specs += [pl.BlockSpec((C, kernel_size), whole),    # depthwise weight
                 pl.BlockSpec((C, C), whole),              # pointwise weight
                 pl.BlockSpec((C, 8), whole)]              # packed vectors
    operands += [w_dw, w_pw, vecs]

    kernel = functools.partial(
        _dds_conv_kernel, kernel_size=kernel_size, dilation=dilation,
        pad=pad, halo=halo, t_tile=t_tile, has_g=has_g,
        approximate_gelu=approximate_gelu, matmul_bf16=matmul_bf16,
        elementwise_bf16=elementwise_bf16)

    xbytes = B * C * T_pad * itemsize
    halo_bytes = B * nT * C * 2 * halo * itemsize
    gbytes = (xbytes + halo_bytes) if has_g else 0
    cost = pl.CostEstimate(
        flops=2 * B * T_pad * C * C + 2 * B * T_pad * C * kernel_size
        + 20 * B * C * T_pad,
        transcendentals=2 * B * C * T_pad,
        bytes_accessed=2 * xbytes + halo_bytes + gbytes
        + 4 * (C * kernel_size + C * C + 8 * C))

    est = _vmem_bytes(C, t_tile, halo, itemsize, has_g, kernel_size)
    vmem_limit = int(min(max(32 << 20, int(est * 1.3)), 60 << 20))

    out = pl.pallas_call(
        kernel,
        out_shape=jax.ShapeDtypeStruct((B, C, T_pad), x.dtype),
        grid_spec=pltpu.PrefetchScalarGridSpec(
            num_scalar_prefetch=0,
            grid=(B, nT),
            in_specs=in_specs,
            out_specs=pl.BlockSpec((1, C, t_tile), lambda b, t: (b, 0, t))),
        compiler_params=pltpu.CompilerParams(
            dimension_semantics=("parallel", "parallel"),
            vmem_limit_bytes=vmem_limit),
        cost_estimate=cost,
    )(*operands)

    return out[:, :, :T] if T_pad != T else out


# ---------------- pure-JAX reference (for verification) ----------------
def _reference(x, params, *, index, kernel_size, g=None, approximate=False):
    if g is not None:
        x = x + g
    B, C, T = x.shape
    dilation = kernel_size ** index
    pad = (kernel_size * dilation - dilation) // 2
    xp = jnp.pad(x, ((0, 0), (0, 0), (pad, pad)))

    y = jnp.zeros((B, C, T), jnp.float32)
    for k in range(kernel_size):
        y = y + params["w_dw"][None, :, k:k + 1] * xp[:, :, k * dilation:k * dilation + T]
    y = y + params["b_dw"][None, :, None]

    def ln(z, gamma, beta):
        mean = jnp.mean(z, axis=1, keepdims=True)
        var = jnp.mean((z - mean) ** 2, axis=1, keepdims=True)
        return (z - mean) / jnp.sqrt(var + EPS) * gamma[None, :, None] + beta[None, :, None]

    y = jax.nn.gelu(ln(y, params["gamma1"], params["beta1"]), approximate=approximate)
    y = jnp.einsum("oc,bct->bot", params["w_pw"], y) + params["b_pw"][None, :, None]
    y = jax.nn.gelu(ln(y, params["gamma2"], params["beta2"]), approximate=approximate)
    return x + y


if __name__ == "__main__":
    # TODO(synk): dropout (dropout_rate=0.0 in the module) is never applied, so
    # it is not implemented.
    def make_params(key, C, K):
        ks = jax.random.split(key, 4)
        return {
            # Conv1d(C, C, K, groups=C) weight (C, 1, K) -> (C, K)
            "w_dw": 0.3 * jax.random.normal(ks[0], (C, K), jnp.float32),
            "b_dw": 0.1 * jax.random.normal(ks[1], (C,), jnp.float32),
            "gamma1": jnp.ones((C,), jnp.float32),
            "beta1": jnp.zeros((C,), jnp.float32),
            # Conv1d(C, C, 1) weight (C, C, 1) -> (C, C)
            "w_pw": 0.3 * jax.random.normal(ks[2], (C, C), jnp.float32),
            "b_pw": 0.1 * jax.random.normal(ks[3], (C,), jnp.float32),
            "gamma2": jnp.ones((C,), jnp.float32),
            "beta2": jnp.zeros((C,), jnp.float32),
        }

    key = jax.random.PRNGKey(0)
    k1, k2, k3, k4, k5, k6, k7, k8 = jax.random.split(key, 8)

    # --- small module-consistent shape (exercises host T padding, 1 tile) ---
    B, C, T, K, index = 2, 4, 16, 3, 1      # dilation = 3, padding = 3
    params = make_params(k1, C, K)
    x = jax.random.normal(k2, (B, C, T), jnp.float32)
    g = jax.random.normal(k3, (B, C, T), jnp.float32)

    # Default (tanh/EUP GELU) vs matching reference.
    out = jax.block_until_ready(
        dds_conv_layer(x, params, index=index, kernel_size=K, g=g))
    ref = _reference(x, params, index=index, kernel_size=K, g=g, approximate=True)
    assert out.shape == (B, C, T)
    assert jnp.allclose(out, ref, atol=2e-4, rtol=2e-4), "mismatch (small, g)"

    # Exact-erf mode vs the module's exact forward.
    out_exact = jax.block_until_ready(
        dds_conv_layer(x, params, index=index, kernel_size=K, g=g,
                       approximate_gelu=False))
    ref_exact = _reference(x, params, index=index, kernel_size=K, g=g,
                           approximate=False)
    assert jnp.allclose(out_exact, ref_exact, atol=2e-4, rtol=2e-4), \
        "mismatch (small, exact gelu)"

    # No-conditioning path.
    out0 = jax.block_until_ready(
        dds_conv_layer(x, params, index=index, kernel_size=K))
    ref0 = _reference(x, params, index=index, kernel_size=K, approximate=True)
    assert jnp.allclose(out0, ref0, atol=2e-4, rtol=2e-4), "mismatch (small, no g)"

    # --- lane-dense shape (exercises the T-tiled path with halo reads) ---
    B2, C2, T2, K2, index2 = 2, 8, 2048, 3, 2      # dilation = 9, padding = 9
    params2 = make_params(k4, C2, K2)
    x2 = jax.random.normal(k5, (B2, C2, T2), jnp.float32)
    g2 = jax.random.normal(k6, (B2, C2, T2), jnp.float32)

    out2 = jax.block_until_ready(
        dds_conv_layer(x2, params2, index=index2, kernel_size=K2, g=g2))
    ref2 = _reference(x2, params2, index=index2, kernel_size=K2, g=g2,
                      approximate=True)
    assert jnp.allclose(out2, ref2, atol=2e-4, rtol=2e-4), "mismatch (tiled)"

    # bf16 elementwise variant (v6e/v7x option) -- loose tolerance sanity check.
    out2b = jax.block_until_ready(
        dds_conv_layer(x2, params2, index=index2, kernel_size=K2, g=g2,
                       elementwise_bf16=True))
    assert bool(jnp.all(jnp.isfinite(out2b)))
    assert jnp.allclose(out2b, ref2, atol=0.3, rtol=0.05), "mismatch (bf16 elemwise)"

    # --- awkward T (not a multiple of 128): host padding path ---
    B3, C3, T3, K3, index3 = 2, 8, 300, 3, 1       # dilation = 3, padding = 3
    params3 = make_params(k7, C3, K3)
    x3 = jax.random.normal(k8, (B3, C3, T3), jnp.float32)

    out3 = jax.block_until_ready(
        dds_conv_layer(x3, params3, index=index3, kernel_size=K3))
    ref3 = _reference(x3, params3, index=index3, kernel_size=K3, approximate=True)
    assert out3.shape == (B3, C3, T3)
    assert jnp.allclose(out3, ref3, atol=2e-4, rtol=2e-4), "mismatch (odd T)"

    print("KERNEL_OK")
</pallas_src>

<mosaic_0001>
module attributes {stable_mosaic.version = 11 : i64} {
  func.func @_dds_conv_kernel(%arg0: i32, %arg1: i32, %arg2: memref<1x4x128xf32, #tpu.memory_space<vmem>>, %arg3: memref<1x4x128xf32, #tpu.memory_space<vmem>>, %arg4: memref<1x4x128xf32, #tpu.memory_space<vmem>>, %arg5: memref<1x4x128xf32, #tpu.memory_space<vmem>>, %arg6: memref<1x4x128xf32, #tpu.memory_space<vmem>>, %arg7: memref<1x4x128xf32, #tpu.memory_space<vmem>>, %arg8: memref<4x3xf32, #tpu.memory_space<vmem>>, %arg9: memref<4x4xf32, #tpu.memory_space<vmem>>, %arg10: memref<4x8xf32, #tpu.memory_space<vmem>>, %arg11: memref<1x4x128xf32, #tpu.memory_space<vmem>>) attributes {dimension_semantics = [#tpu.dimension_semantics<parallel>, #tpu.dimension_semantics<parallel>], iteration_bounds = array<i64: 2, 1>, scalar_prefetch = 0 : i64, scratch_operands = 0 : i64, tpu.core_type = #tpu.core_type<tc>, window_params = [{transform_indices = @transform_0, window_bounds = array<i64: 1, 4, 128>}, {transform_indices = @transform_1, window_bounds = array<i64: 1, 4, 128>}, {transform_indices = @transform_2, window_bounds = array<i64: 1, 4, 128>}, {transform_indices = @transform_3, window_bounds = array<i64: 1, 4, 128>}, {transform_indices = @transform_4, window_bounds = array<i64: 1, 4, 128>}, {transform_indices = @transform_5, window_bounds = array<i64: 1, 4, 128>}, {pipeline_mode = #tpu.pipeline_mode<synchronous>, transform_indices = @transform_6, window_bounds = array<i64: 4, 3>}, {pipeline_mode = #tpu.pipeline_mode<synchronous>, transform_indices = @transform_7, window_bounds = array<i64: 4, 4>}, {pipeline_mode = #tpu.pipeline_mode<synchronous>, transform_indices = @transform_8, window_bounds = array<i64: 4, 8>}, {transform_indices = @transform_9, window_bounds = array<i64: 1, 4, 128>}]} {
    %c0 = arith.constant 0 : index
    %c0_0 = arith.constant 0 : index
    %c0_1 = arith.constant 0 : index
    %0 = vector.load %arg2[%c0, %c0_0, %c0_1] : memref<1x4x128xf32, #tpu.memory_space<vmem>>, vector<1x4x128xf32>
    %1 = vector.shape_cast %0 : vector<1x4x128xf32> to vector<4x128xf32>
    %c0_2 = arith.constant 0 : index
    %c0_3 = arith.constant 0 : index
    %c0_4 = arith.constant 0 : index
    %2 = vector.load %arg3[%c0_2, %c0_3, %c0_4] : memref<1x4x128xf32, #tpu.memory_space<vmem>>, vector<1x4x128xf32>
    %3 = vector.shape_cast %2 : vector<1x4x128xf32> to vector<4x128xf32>
    %c0_5 = arith.constant 0 : index
    %c0_6 = arith.constant 0 : index
    %c0_7 = arith.constant 0 : index
    %4 = vector.load %arg4[%c0_5, %c0_6, %c0_7] : memref<1x4x128xf32, #tpu.memory_space<vmem>>, vector<1x4x128xf32>
    %5 = vector.shape_cast %4 : vector<1x4x128xf32> to vector<4x128xf32>
    %c0_8 = arith.constant 0 : index
    %c0_9 = arith.constant 0 : index
    %c0_10 = arith.constant 0 : index
    %6 = vector.load %arg5[%c0_8, %c0_9, %c0_10] : memref<1x4x128xf32, #tpu.memory_space<vmem>>, vector<1x4x128xf32>
    %7 = vector.shape_cast %6 : vector<1x4x128xf32> to vector<4x128xf32>
    %8 = arith.addf %1, %7 : vector<4x128xf32>
    %c0_11 = arith.constant 0 : index
    %c0_12 = arith.constant 0 : index
    %c0_13 = arith.constant 0 : index
    %9 = vector.load %arg6[%c0_11, %c0_12, %c0_13] : memref<1x4x128xf32, #tpu.memory_space<vmem>>, vector<1x4x128xf32>
    %10 = vector.shape_cast %9 : vector<1x4x128xf32> to vector<4x128xf32>
    %11 = arith.addf %3, %10 : vector<4x128xf32>
    %c0_14 = arith.constant 0 : index
    %c0_15 = arith.constant 0 : index
    %c0_16 = arith.constant 0 : index
    %12 = vector.load %arg7[%c0_14, %c0_15, %c0_16] : memref<1x4x128xf32, #tpu.memory_space<vmem>>, vector<1x4x128xf32>
    %13 = vector.shape_cast %12 : vector<1x4x128xf32> to vector<4x128xf32>
    %14 = arith.addf %5, %13 : vector<4x128xf32>
    %15 = vector.broadcast %arg1 : i32 to vector<4x128xi32>
    %c0_i32 = arith.constant 0 : i32
    %16 = vector.broadcast %c0_i32 : i32 to vector<4x128xi32>
    %17 = arith.cmpi sgt, %15, %16 : vector<4x128xi32>
    %cst = arith.constant 0.000000e+00 : f32
    %18 = vector.broadcast %cst : f32 to vector<4x128xf32>
    %19 = arith.select %17, %11, %18 : vector<4x128xi1>, vector<4x128xf32>
    %20 = vector.broadcast %arg1 : i32 to vector<4x128xi32>
    %c0_i32_17 = arith.constant 0 : i32
    %21 = vector.broadcast %c0_i32_17 : i32 to vector<4x128xi32>
    %22 = arith.cmpi slt, %20, %21 : vector<4x128xi32>
    %cst_18 = arith.constant 0.000000e+00 : f32
    %23 = vector.broadcast %cst_18 : f32 to vector<4x128xf32>
    %24 = arith.select %22, %14, %23 : vector<4x128xi1>, vector<4x128xf32>
    %c0_19 = arith.constant 0 : index
    %c0_20 = arith.constant 0 : index
    %25 = vector.load %arg10[%c0_19, %c0_20] : memref<4x8xf32, #tpu.memory_space<vmem>>, vector<4x8xf32>
    %26 = vector.extract_strided_slice %25 {offsets = [0, 0], sizes = [4, 1], strides = [1, 1]} : vector<4x8xf32> to vector<4x1xf32>
    %27 = vector.extract_strided_slice %25 {offsets = [0, 1], sizes = [4, 1], strides = [1, 1]} : vector<4x8xf32> to vector<4x1xf32>
    %28 = vector.extract_strided_slice %25 {offsets = [0, 2], sizes = [4, 1], strides = [1, 1]} : vector<4x8xf32> to vector<4x1xf32>
    %29 = vector.extract_strided_slice %25 {offsets = [0, 3], sizes = [4, 1], strides = [1, 1]} : vector<4x8xf32> to vector<4x1xf32>
    %30 = vector.extract_strided_slice %25 {offsets = [0, 4], sizes = [4, 1], strides = [1, 1]} : vector<4x8xf32> to vector<4x1xf32>
    %31 = vector.extract_strided_slice %25 {offsets = [0, 5], sizes = [4, 1], strides = [1, 1]} : vector<4x8xf32> to vector<4x1xf32>
    %c0_21 = arith.constant 0 : index
    %c0_22 = arith.constant 0 : index
    %32 = vector.load %arg8[%c0_21, %c0_22] : memref<4x3xf32, #tpu.memory_space<vmem>>, vector<4x3xf32>
    %cst_23 = arith.constant 0.000000e+00 : f32
    %33 = vector.broadcast %cst_23 : f32 to vector<4x128xf32>
    %34 = vector.extract_strided_slice %32 {offsets = [0, 0], sizes = [4, 1], strides = [1, 1]} : vector<4x3xf32> to vector<4x1xf32>
    %35 = vector.extract_strided_slice %19 {offsets = [0, 125], sizes = [4, 3], strides = [1, 1]} : vector<4x128xf32> to vector<4x3xf32>
    %36 = vector.extract_strided_slice %8 {offsets = [0, 0], sizes = [4, 125], strides = [1, 1]} : vector<4x128xf32> to vector<4x125xf32>
    %37 = tpu.concatenate %35, %36 in 1 : vector<4x3xf32>, vector<4x125xf32> -> vector<4x128xf32>
    %38 = vector.broadcast %34 : vector<4x1xf32> to vector<4x128xf32>
    %39 = arith.mulf %38, %37 : vector<4x128xf32>
    %40 = arith.addf %33, %39 : vector<4x128xf32>
    %41 = vector.extract_strided_slice %32 {offsets = [0, 1], sizes = [4, 1], strides = [1, 1]} : vector<4x3xf32> to vector<4x1xf32>
    %42 = vector.broadcast %41 : vector<4x1xf32> to vector<4x128xf32>
    %43 = arith.mulf %42, %8 : vector<4x128xf32>
    %44 = arith.addf %40, %43 : vector<4x128xf32>
    %45 = vector.extract_strided_slice %32 {offsets = [0, 2], sizes = [4, 1], strides = [1, 1]} : vector<4x3xf32> to vector<4x1xf32>
    %46 = vector.extract_strided_slice %8 {offsets = [0, 3], sizes = [4, 125], strides = [1, 1]} : vector<4x128xf32> to vector<4x125xf32>
    %47 = vector.extract_strided_slice %24 {offsets = [0, 0], sizes = [4, 3], strides = [1, 1]} : vector<4x128xf32> to vector<4x3xf32>
    %48 = tpu.concatenate %46, %47 in 1 : vector<4x125xf32>, vector<4x3xf32> -> vector<4x128xf32>
    %49 = vector.broadcast %45 : vector<4x1xf32> to vector<4x128xf32>
    %50 = arith.mulf %49, %48 : vector<4x128xf32>
    %51 = arith.addf %44, %50 : vector<4x128xf32>
    %52 = vector.broadcast %26 : vector<4x1xf32> to vector<4x128xf32>
    %53 = arith.addf %51, %52 : vector<4x128xf32>
    %cst_24 = arith.constant dense<0.000000e+00> : vector<128xf32>
    %54 = vector.multi_reduction <add>, %53, %cst_24 [0] : vector<4x128xf32> to vector<128xf32>
    %55 = vector.shape_cast %54 : vector<128xf32> to vector<1x128xf32>
    %cst_25 = arith.constant 4.000000e+00 : f32
    %56 = vector.broadcast %cst_25 : f32 to vector<1x128xf32>
    %57 = arith.divf %55, %56 : vector<1x128xf32>
    %58 = arith.mulf %53, %53 : vector<4x128xf32>
    %cst_26 = arith.constant dense<0.000000e+00> : vector<128xf32>
    %59 = vector.multi_reduction <add>, %58, %cst_26 [0] : vector<4x128xf32> to vector<128xf32>
    %60 = vector.shape_cast %59 : vector<128xf32> to vector<1x128xf32>
    %cst_27 = arith.constant 4.000000e+00 : f32
    %61 = vector.broadcast %cst_27 : f32 to vector<1x128xf32>
    %62 = arith.divf %60, %61 : vector<1x128xf32>
    %63 = arith.mulf %57, %57 : vector<1x128xf32>
    %64 = arith.subf %62, %63 : vector<1x128xf32>
    %cst_28 = arith.constant 9.99999974E-6 : f32
    %65 = vector.broadcast %cst_28 : f32 to vector<1x128xf32>
    %66 = arith.addf %64, %65 : vector<1x128xf32>
    %67 = math.rsqrt %66 : vector<1x128xf32>
    %68 = vector.broadcast %57 : vector<1x128xf32> to vector<4x128xf32>
    %69 = arith.subf %53, %68 : vector<4x128xf32>
    %70 = vector.broadcast %67 : vector<1x128xf32> to vector<4x128xf32>
    %71 = arith.mulf %69, %70 : vector<4x128xf32>
    %72 = vector.broadcast %27 : vector<4x1xf32> to vector<4x128xf32>
    %73 = arith.mulf %71, %72 : vector<4x128xf32>
    %74 = vector.broadcast %28 : vector<4x1xf32> to vector<4x128xf32>
    %75 = arith.addf %73, %74 : vector<4x128xf32>
    %76 = arith.mulf %75, %75 : vector<4x128xf32>
    %77 = arith.mulf %75, %76 : vector<4x128xf32>
    %cst_29 = arith.constant 4.471500e-02 : f32
    %78 = vector.broadcast %cst_29 : f32 to vector<4x128xf32>
    %79 = arith.mulf %78, %77 : vector<4x128xf32>
    %80 = arith.addf %75, %79 : vector<4x128xf32>
    %cst_30 = arith.constant 0.797884583 : f32
    %81 = vector.broadcast %cst_30 : f32 to vector<4x128xf32>
    %82 = arith.mulf %81, %80 : vector<4x128xf32>
    %83 = math.tanh %82 : vector<4x128xf32>
    %cst_31 = arith.constant 1.000000e+00 : f32
    %84 = vector.broadcast %cst_31 : f32 to vector<4x128xf32>
    %85 = arith.addf %84, %83 : vector<4x128xf32>
    %cst_32 = arith.constant 5.000000e-01 : f32
    %86 = vector.broadcast %cst_32 : f32 to vector<4x128xf32>
    %87 = arith.mulf %86, %85 : vector<4x128xf32>
    %88 = arith.mulf %75, %87 : vector<4x128xf32>
    %c0_33 = arith.constant 0 : index
    %c0_34 = arith.constant 0 : index
    %89 = vector.load %arg9[%c0_33, %c0_34] : memref<4x4xf32, #tpu.memory_space<vmem>>, vector<4x4xf32>
    %cst_35 = arith.constant dense<0.000000e+00> : vector<4x128xf32>
    %90 = tpu.matmul %89, %88, %cst_35 {dimension_numbers = #tpu.dot_dimension_numbers<[1], [0], [0], [1], [0, 0, 1, 1], [], []>} : vector<4x4xf32>, vector<4x128xf32>, vector<4x128xf32> -> vector<4x128xf32>
    %91 = vector.broadcast %29 : vector<4x1xf32> to vector<4x128xf32>
    %92 = arith.addf %90, %91 : vector<4x128xf32>
    %cst_36 = arith.constant dense<0.000000e+00> : vector<128xf32>
    %93 = vector.multi_reduction <add>, %92, %cst_36 [0] : vector<4x128xf32> to vector<128xf32>
    %94 = vector.shape_cast %93 : vector<128xf32> to vector<1x128xf32>
    %cst_37 = arith.constant 4.000000e+00 : f32
    %95 = vector.broadcast %cst_37 : f32 to vector<1x128xf32>
    %96 = arith.divf %94, %95 : vector<1x128xf32>
    %97 = arith.mulf %92, %92 : vector<4x128xf32>
    %cst_38 = arith.constant dense<0.000000e+00> : vector<128xf32>
    %98 = vector.multi_reduction <add>, %97, %cst_38 [0] : vector<4x128xf32> to vector<128xf32>
    %99 = vector.shape_cast %98 : vector<128xf32> to vector<1x128xf32>
    %cst_39 = arith.constant 4.000000e+00 : f32
    %100 = vector.broadcast %cst_39 : f32 to vector<1x128xf32>
    %101 = arith.divf %99, %100 : vector<1x128xf32>
    %102 = arith.mulf %96, %96 : vector<1x128xf32>
    %103 = arith.subf %101, %102 : vector<1x128xf32>
    %cst_40 = arith.constant 9.99999974E-6 : f32
    %104 = vector.broadcast %cst_40 : f32 to vector<1x128xf32>
    %105 = arith.addf %103, %104 : vector<1x128xf32>
    %106 = math.rsqrt %105 : vector<1x128xf32>
    %107 = vector.broadcast %96 : vector<1x128xf32> to vector<4x128xf32>
    %108 = arith.subf %92, %107 : vector<4x128xf32>
    %109 = vector.broadcast %106 : vector<1x128xf32> to vector<4x128xf32>
    %110 = arith.mulf %108, %109 : vector<4x128xf32>
    %111 = vector.broadcast %30 : vector<4x1xf32> to vector<4x128xf32>
    %112 = arith.mulf %110, %111 : vector<4x128xf32>
    %113 = vector.broadcast %31 : vector<4x1xf32> to vector<4x128xf32>
    %114 = arith.addf %112, %113 : vector<4x128xf32>
    %115 = arith.mulf %114, %114 : vector<4x128xf32>
    %116 = arith.mulf %114, %115 : vector<4x128xf32>
    %cst_41 = arith.constant 4.471500e-02 : f32
    %117 = vector.broadcast %cst_41 : f32 to vector<4x128xf32>
    %118 = arith.mulf %117, %116 : vector<4x128xf32>
    %119 = arith.addf %114, %118 : vector<4x128xf32>
    %cst_42 = arith.constant 0.797884583 : f32
    %120 = vector.broadcast %cst_42 : f32 to vector<4x128xf32>
    %121 = arith.mulf %120, %119 : vector<4x128xf32>
    %122 = math.tanh %121 : vector<4x128xf32>
    %cst_43 = arith.constant 1.000000e+00 : f32
    %123 = vector.broadcast %cst_43 : f32 to vector<4x128xf32>
    %124 = arith.addf %123, %122 : vector<4x128xf32>
    %cst_44 = arith.constant 5.000000e-01 : f32
    %125 = vector.broadcast %cst_44 : f32 to vector<4x128xf32>
    %126 = arith.mulf %125, %124 : vector<4x128xf32>
    %127 = arith.mulf %114, %126 : vector<4x128xf32>
    %128 = arith.addf %8, %127 : vector<4x128xf32>
    %c0_45 = arith.constant 0 : index
    %c0_46 = arith.constant 0 : index
    %c0_47 = arith.constant 0 : index
    %129 = vector.load %arg11[%c0_45, %c0_46, %c0_47] : memref<1x4x128xf32, #tpu.memory_space<vmem>>, vector<1x4x128xf32>
    %130 = vector.shape_cast %129 : vector<1x4x128xf32> to vector<4x128xf32>
    %131 = vector.shape_cast %128 : vector<4x128xf32> to vector<1x4x128xf32>
    tpu.vector_store %arg11[%c0_45, %c0_46, %c0_47], %131 {strides = array<i32>} : memref<1x4x128xf32, #tpu.memory_space<vmem>>, vector<1x4x128xf32>,
    return
  }
  func.func @transform_0(%arg0: i32, %arg1: i32) -> (i32, i32, i32) {
    %c0_i32 = arith.constant 0 : i32
    %c0_i32_0 = arith.constant 0 : i32
    return %arg0, %c0_i32, %arg1 : i32, i32, i32
  }
  func.func @transform_1(%arg0: i32, %arg1: i32) -> (i32, i32, i32) {
    %c1_i32 = arith.constant 1 : i32
    %0 = arith.muli %arg1, %c1_i32 : i32
    %c1_i32_0 = arith.constant 1 : i32
    %1 = arith.subi %0, %c1_i32_0 : i32
    %c0_i32 = arith.constant 0 : i32
    %2 = arith.maxsi %1, %c0_i32 : i32
    %c0_i32_1 = arith.constant 0 : i32
    %c0_i32_2 = arith.constant 0 : i32
    return %arg0, %c0_i32_1, %2 : i32, i32, i32
  }
  func.func @transform_2(%arg0: i32, %arg1: i32) -> (i32, i32, i32) {
    %c1_i32 = arith.constant 1 : i32
    %0 = arith.addi %arg1, %c1_i32 : i32
    %c1_i32_0 = arith.constant 1 : i32
    %1 = arith.muli %0, %c1_i32_0 : i32
    %c0_i32 = arith.constant 0 : i32
    %2 = arith.minsi %1, %c0_i32 : i32
    %c0_i32_1 = arith.constant 0 : i32
    %c0_i32_2 = arith.constant 0 : i32
    return %arg0, %c0_i32_1, %2 : i32, i32, i32
  }
  func.func @transform_3(%arg0: i32, %arg1: i32) -> (i32, i32, i32) {
    %c0_i32 = arith.constant 0 : i32
    %c0_i32_0 = arith.constant 0 : i32
    return %arg0, %c0_i32, %arg1 : i32, i32, i32
  }
  func.func @transform_4(%arg0: i32, %arg1: i32) -> (i32, i32, i32) {
    %c1_i32 = arith.constant 1 : i32
    %0 = arith.muli %arg1, %c1_i32 : i32
    %c1_i32_0 = arith.constant 1 : i32
    %1 = arith.subi %0, %c1_i32_0 : i32
    %c0_i32 = arith.constant 0 : i32
    %2 = arith.maxsi %1, %c0_i32 : i32
    %c0_i32_1 = arith.constant 0 : i32
    %c0_i32_2 = arith.constant 0 : i32
    return %arg0, %c0_i32_1, %2 : i32, i32, i32
  }
  func.func @transform_5(%arg0: i32, %arg1: i32) -> (i32, i32, i32) {
    %c1_i32 = arith.constant 1 : i32
    %0 = arith.addi %arg1, %c1_i32 : i32
    %c1_i32_0 = arith.constant 1 : i32
    %1 = arith.muli %0, %c1_i32_0 : i32
    %c0_i32 = arith.constant 0 : i32
    %2 = arith.minsi %1, %c0_i32 : i32
    %c0_i32_1 = arith.constant 0 : i32
    %c0_i32_2 = arith.constant 0 : i32
    return %arg0, %c0_i32_1, %2 : i32, i32, i32
  }
  func.func @transform_6(%arg0: i32, %arg1: i32) -> (i32, i32) {
    %c0_i32 = arith.constant 0 : i32
    %c0_i32_0 = arith.constant 0 : i32
    %c0_i32_1 = arith.constant 0 : i32
    return %c0_i32, %c0_i32_0 : i32, i32
  }
  func.func @transform_7(%arg0: i32, %arg1: i32) -> (i32, i32) {
    %c0_i32 = arith.constant 0 : i32
    %c0_i32_0 = arith.constant 0 : i32
    %c0_i32_1 = arith.constant 0 : i32
    return %c0_i32, %c0_i32_0 : i32, i32
  }
  func.func @transform_8(%arg0: i32, %arg1: i32) -> (i32, i32) {
    %c0_i32 = arith.constant 0 : i32
    %c0_i32_0 = arith.constant 0 : i32
    %c0_i32_1 = arith.constant 0 : i32
    return %c0_i32, %c0_i32_0 : i32, i32
  }
  func.func @transform_9(%arg0: i32, %arg1: i32) -> (i32, i32, i32) {
    %c0_i32 = arith.constant 0 : i32
    %c0_i32_0 = arith.constant 0 : i32
    return %arg0, %c0_i32, %arg1 : i32, i32, i32
  }
}

</mosaic_0001>

<bundles_post_ra>
// kernel: tpu_custom_call.1
= control target key start
LH: loop header
LB: loop body
LE: loop exit
PB: predicated region body
PF: predicated region fallthrough
CT: control target
= control target key end

     0   :  { %s1931_s0 = inlined_call_operand.hbm [shape: f32[2,4,128], index: 0, kind: input, shape index: {}]   ;;  %s1932_s1 = inlined_call_operand.hbm [shape: f32[2,4,128], index: 1, kind: input, shape index: {}]   ;;  %s1933_s2 = inlined_call_operand.hbm [shape: f32[2,4,128], index: 2, kind: input, shape index: {}]   ;;  %s1934_s3 = inlined_call_operand.hbm [shape: f32[2,4,128], index: 3, kind: input, shape index: {}]   ;;  %s1935_s4 = inlined_call_operand.hbm [shape: f32[2,4,128], index: 4, kind: input, shape index: {}]   ;;  %s1936_s5 = inlined_call_operand.hbm [shape: f32[2,4,128], index: 5, kind: input, shape index: {}]   ;;  %s1937_s6 = inlined_call_operand.vmem [shape: f32[4,3], index: 6, kind: input, shape index: {}]   ;;  %s1938_s7 = inlined_call_operand.hbm [shape: f32[4,4], index: 7, kind: input, shape index: {}]   ;;  %s1939_s8 = inlined_call_operand.hbm [shape: f32[4,8], index: 8, kind: input, shape index: {}]   ;;  %s1940_s9 = inlined_call_operand.hbm [shape: f32[2,4,128], index: 9, kind: output, shape index: {}]  }
   0x1   :  { %1951 = sst [smem:[#allocation31_spill]] %s1931_s0 }
   0x2   :  { %1952 = sst [smem:[#allocation32_spill]] %s1932_s1 }
   0x3   :  { %1953 = sst [smem:[#allocation33_spill]] %s1933_s2 }
   0x4   :  { %1954 = sst [smem:[#allocation34_spill]] %s1938_s7 }
   0x5   :  { %1955 = sst [smem:[#allocation35_spill]] %s1940_s9 }
   0x6   :  { %14 = vsyncpa [#allocation3], 0 }
   0x7   :  { %16 = vsyncpa [#allocation3 + $0x1], 0 }
   0x8   :  { %17 = vsyncpa [#allocation6], 0 }
   0x9   :  { %19 = vsyncpa [#allocation6 + $0x1], 0 }
   0xa   :  { %20 = vsyncpa [#allocation9], 0 }
   0xb   :  { %22 = vsyncpa [#allocation9 + $0x1], 0 }
   0xc   :  { %23 = vsyncpa [#allocation12], 0 }
   0xd   :  { %25 = vsyncpa [#allocation12 + $0x1], 0 }
   0xe   :  { %26 = vsyncpa [#allocation15], 0 }
   0xf   :  { %27 = vsyncpa [#allocation4], 0 }
  0x10   :  { %29 = vsyncpa [#allocation4 + $0x1], 0  ;;  %s1660_s30 = smov 0   ;;  %s1662_s10 = smov 0  }
  0x11   :  { %s1664_s11 = smov 0   ;;  %s1666_s12 = smov 0  }
  0x12   :  { %s1668_s13 = smov 0   ;;  %s1670_s14 = smov 0  }
  0x13 LB: > { %1956 = sst [smem:[#allocation24_spill]] %s1576_s30  ;;  %s1691_s15 = sadd.s32 4294967295, %s1596_s14   ;;  %s1596_s14 = sphi %s1670_s14, %s35_s14   ;;  %s1592_s13 = sphi %s1668_s13, %s1983_s13   ;;  %s1588_s12 = sphi %s1666_s12, %s1982_s12   ;;  %s1584_s11 = sphi %s1664_s11, %s1986_s11   ;;  %s1580_s10 = sphi %s1662_s10, %s1985_s10   ;;  %s1576_s30 = sphi %s1660_s30, %s1984_s30  }
  0x14   : > { %1957 = sst [smem:[#allocation25_spill]] %s1592_s13  ;;  %s1083_s16 = sadd.s32 4294967294, %s1596_s14  }
  0x15   : > { %1958 = sst [smem:[#allocation26_spill]] %s1596_s14  ;;  %p63_p0 = scmp.ne.s32.totalorder %s1584_s11, %s1580_s10 }
  0x16   : > { %p64_p1 = scmp.eq.s32.totalorder %s1596_s14, 0  ;;  %p69_p2 = scmp.ne.s32.totalorder %s1580_s10, %s1576_s30 }
  0x17   : > { %p70_p3 = scmp.eq.s32.totalorder %s1691_s15, 0  ;;  %p322_p4 = scmp.eq.s32.totalorder %s1691_s15, 1 }
  0x18   : > { %p1702_p5 = por %p64_p1, %p63_p0  ;;  %p328_p6 = scmp.eq.s32.totalorder %s1083_s16, 1 }
  0x19   : > { %p1708_p7 = por %p70_p3, %p69_p2  ;;  %p1712_p8 = por %p322_p4, %p63_p0 }
  0x1a   : > { %p1716_p9 = por %p328_p6, %p69_p2  ;;  %p1084_p10 = scmp.ge.s32.totalorder %s1596_s14, 1 }
  0x1b   : > { %s1961_s20 = scalar_select %p1712_p8, 1, 0 }
  0x1c   : > { %s1963_s21 = scalar_select %p1716_p9, 1, 0 }
  0x1d   : > { %1962 = sst [smem:[#allocation27_spill]] %s1961_s20  ;;  %p335_p11 = scmp.lt.s32.totalorder %s1596_s14, 3 }
  0x1e   : > { %1964 = sst [smem:[#allocation28_spill]] %s1963_s21  ;;  %s1598_s26 = smov [#allocation13]  }
  0x1f   : > { %s1965_s7 = sld [smem:[#allocation34_spill]]  ;;  %p1725_p12 = pnand %p1084_p10, %p335_p11 }
  0x20   : > { %s352_s27 = sshll.u32 %s1598_s26, 4  ;;  %p1087_p13 = scmp.ge.s32.totalorder %s1596_s14, 2  ;;  %s353_s27 = int_to_ptr.vmem [resolvable:$true] %s352_s27 }
  0x21   : > { %p1138_p0 = pneg %p1725_p12  ;;  %p1170_p1 = scmp.lt.s32.totalorder %s1596_s14, 2 }
  0x22   : > { %s47_s16 = sadd.s32 1, %s1592_s13  ;;  %s1942_s22 = sand.u32 1, %s1584_s11  }
  0x23   : > { %p1735_p2 = pnand %p1138_p0, %p70_p3  ;;  %p1741_p4 = pnand %p1170_p1, %p1702_p5 }
  0x24   : > { %p49_p6 = scmp.ge.s32.totalorder %s47_s16, 2  ;;  %s1753_s23 = sshll.u32 %s1942_s22, 2 }
  0x25   : > { %s350_s24 = sshll.u32 %s1965_s7, 4  ;;  %s1756_s18 = sshll.u32 %s1592_s13, 2  ;;  %s351_s24 = int_to_ptr.hbm [resolvable:$true] %s350_s24 }
  0x26   : > { %1141 = dma.hbm_to_vmem [thread:$0]  (!%p1735_p2), %s351_s24, 64, %s353_s27, [#allocation12]  }
  0x27   : > { %s1988_s16 = smov (%p49_p6, %s47_s16), 0  ;;  %s1761_s17 = sand.u32 1, %s1596_s14  }
  0x28   : > { %1969 = sst [smem:[#allocation29_spill]] %s1988_s16  ;;  %s51_s26 = ssub.s32 %s1592_s13, %s1988_s16 }
  0x29   : > { %p54_p5 = scmp.eq.s32.totalorder %s51_s26, 0  ;;  %s1970_s1 = sld [smem:[#allocation32_spill]] }
  0x2a   : > { %s1971_s21 = sadd.s32 1, %s1584_s11  ;;  %s399_s20 = scalar_lea.vmem [#allocation5], %s1753_s23 }
  0x2b   : > { %s1770_s22 = scalar_select %p54_p5, %s1584_s11, %s1971_s21  }
  0x2c   : > { %s411_s9 = sshll.u32 %s399_s20, 4  ;;  %s396_s16 = scalar_lea.sflag [#allocation6], %s1761_s17  ;;  %s412_s9 = int_to_ptr.vmem [resolvable:$true] %s411_s9 }
  0x2d   : > { %1972 = sst [smem:[#allocation30_spill]] %s1770_s22  ;;  %s450_s27 = scalar_lea.hbm %s1934_s3, %s1756_s18 }
  0x2e   : > { %s445_s21 = scalar_lea.vmem [#allocation8], %s1753_s23  ;;  %s452_s13 = sshll.u32 %s450_s27, 4  ;;  %s453_s13 = int_to_ptr.hbm [resolvable:$true] %s452_s13 }
  0x2f   : > { %s407_s7 = scalar_lea.hbm %s1970_s1, %s1756_s18  ;;  %s454_s1 = sshll.u32 %s445_s21, 4  ;;  %s455_s1 = int_to_ptr.vmem [resolvable:$true] %s454_s1 }
  0x30   : > { %s409_s30 = sshll.u32 %s407_s7, 4  ;;  %s362_s22 = sshll.u32 %s1939_s8, 4  ;;  %s410_s30 = int_to_ptr.hbm [resolvable:$true] %s409_s30  ;;  %s363_s22 = int_to_ptr.hbm [resolvable:$true] %s362_s22 }
  0x31   : > { %1151 = dma.hbm_to_vmem [thread:$0]  (!%p1741_p4), %s410_s30, 64, %s412_s9, %s396_s16  }
  0x32   : > { %s442_s14 = scalar_lea.sflag [#allocation9], %s1761_s17  ;;  %s1599_s9 = smov [#allocation14]  }
  0x33   : > { %1157 = dma.hbm_to_vmem [thread:$0]  (!%p1741_p4), %s453_s13, 64, %s455_s1, %s442_s14  }
  0x34   : > { %s364_s30 = sshll.u32 %s1599_s9, 4  ;;  %s1973_s0 = sld [smem:[#allocation31_spill]]  ;;  %s365_s30 = int_to_ptr.vmem [resolvable:$true] %s364_s30 }
  0x35   : > { %1144 = dma.hbm_to_vmem [thread:$0]  (!%p1735_p2), %s363_s22, 64, %s365_s30, [#allocation15]  }
  0x36   : > { %s379_s21 = scalar_lea.vmem [#allocation2], %s1753_s23  ;;  %s1974_s1 = sand.u32 1, %s1584_s11  }
  0x37   : > { %s388_s7 = sshll.u32 %s379_s21, 4  ;;  %s376_s13 = scalar_lea.sflag [#allocation3], %s1974_s1  ;;  %s389_s7 = int_to_ptr.vmem [resolvable:$true] %s388_s7 }
  0x38   : > { %s1975_s2 = sld [smem:[#allocation33_spill]]  ;;  %s422_s30 = scalar_lea.vmem [#allocation7], %s1753_s23 }
  0x39   : > { %s434_s26 = sshll.u32 %s422_s30, 4  ;;  %s473_s1 = scalar_lea.hbm %s1935_s4, %s1756_s18  ;;  %s435_s26 = int_to_ptr.vmem [resolvable:$true] %s434_s26 }
  0x3a   : > { %s384_s27 = scalar_lea.hbm %s1973_s0, %s1756_s18  ;;  %s488_s0 = scalar_lea.vmem [#allocation11], %s1753_s23 }
  0x3b   : > { %s386_s20 = sshll.u32 %s384_s27, 4  ;;  %s387_s20 = int_to_ptr.hbm [resolvable:$true] %s386_s20 }
  0x3c   : > { %1148 = dma.hbm_to_vmem [thread:$0]  (!%p1741_p4), %s387_s20, 64, %s389_s7, %s376_s13  }
  0x3d   : > { %s465_s7 = scalar_lea.vmem [#allocation10], %s1753_s23  ;;  %s475_s13 = sshll.u32 %s473_s1, 4  ;;  %s476_s13 = int_to_ptr.hbm [resolvable:$true] %s475_s13 }
  0x3e   : > { %s430_s9 = scalar_lea.hbm %s1975_s2, %s1756_s18  ;;  %s477_s20 = sshll.u32 %s465_s7, 4  ;;  %s478_s20 = int_to_ptr.vmem [resolvable:$true] %s477_s20 }
  0x3f   : > { %s432_s24 = sshll.u32 %s430_s9, 4  ;;  %s496_s9 = scalar_lea.hbm %s1936_s5, %s1756_s18  ;;  %s433_s24 = int_to_ptr.hbm [resolvable:$true] %s432_s24 }
  0x40   : > { %1154 = dma.hbm_to_vmem [thread:$0]  (!%p1741_p4), %s433_s24, 64, %s435_s26, %s396_s16  }
  0x41   : > { %1160 = dma.hbm_to_vmem [thread:$0]  (!%p1741_p4), %s476_s13, 64, %s478_s20, %s442_s14  }
  0x42   : > { %s498_s30 = sshll.u32 %s496_s9, 4  ;;  %s500_s2 = sshll.u32 %s488_s0, 4  ;;  %s499_s30 = int_to_ptr.hbm [resolvable:$true] %s498_s30  ;;  %s501_s2 = int_to_ptr.vmem [resolvable:$true] %s500_s2 }
  0x43   : > { %s485_s16 = scalar_lea.sflag [#allocation12], %s1761_s17  ;;  %509 = sbr.rel (%p1725_p12) target bundleno = 492 (0x1ec), region = 56 }
  0x44   : > { %1163 = dma.hbm_to_vmem [thread:$0]  (!%p1741_p4), %s499_s30, 64, %s501_s2, %s485_s16  }
  0x45   : > { %s1831_s26 = sand.u32 (!%p1725_p12), 1, %s1580_s10  }
  0x46   : > { %s1834_s14 = sshll.u32 (!%p1725_p12), %s1831_s26, 2  ;;  %s512_s18 = scalar_lea.sflag (!%p1725_p12), [#allocation3], %s1831_s26 }
  0x47   : > { %s515_s23 = scalar_lea.vmem (!%p1725_p12), [#allocation2], %s1834_s14 }
  0x48   : > { %1547 = dma.done.wait (%p1708_p7), %s512_s18, 64  }
  0x49   : > { %1549 = vsyncadd (%p1708_p7), %s512_s18, 4294967232  ;;  %s521_s0 = sand.u32 1, %s1691_s15  }
  0x4a   : > { %s522_s2 = scalar_lea.sflag [#allocation6], %s521_s0 }
  0x4b   : > { %1551 = dma.done.wait (%p1708_p7), %s522_s2, 128  }
  0x4c   : > { %1553 = vsyncadd (%p1708_p7), %s522_s2, 4294967168  ;;  %s542_s17 = scalar_lea.sflag [#allocation9], %s521_s0  ;;  %s545_s25 = scalar_lea.vmem [#allocation8], %s1834_s14 }
  0x4d   : > { %1555 = dma.done.wait (%p1708_p7), %s542_s17, 128  }
  0x4e   : > { %1557 = vsyncadd (%p1708_p7), %s542_s17, 4294967168  ;;  %s562_s29 = scalar_lea.sflag [#allocation12], %s521_s0 }
  0x4f   : > { %1559 = dma.done.wait (%p1708_p7), %s562_s29, 64  }
  0x50   : > { %1561 = vsyncadd (%p1708_p7), %s562_s29, 4294967232 }
  0x51   : > { %1563 = dma.done.wait (%p70_p3), [#allocation12], 64  }
  0x52   : > { %1565 = vsyncadd (%p70_p3), [#allocation12], 4294967232 }
  0x53   : > { %1567 = dma.done.wait (%p70_p3), [#allocation15], 64  }
  0x54   : > { %1569 = vsyncadd (%p70_p3), [#allocation15], 4294967232  ;;  %v1600_v0 = vmov 0.0   ;;  %s1601_s24 = smov 3   ;;  %v1602_v1 = vmov 0   ;;  %v1603_v2 = vmov 2  }
  0x55   : > { %665 = vrot.lane.b32.xlu0 %v1600_v0, %s1601_s24  ;;  %1234 = vset.pattern.permute.xlu1 %v1602_v1  ;;  %v1604_v3 = vmov 1   ;;  %v663_v4 = vld [vmem:[%s1937_s6] sm:$0xf]  ;;  %v651_v6 = vld [vmem:[%s545_s25] sm:$0xf]  ;;  %s1605_s15 = smov 125  }
  0x56   : > { %1236 = vset.pattern.permute.xlu0 %v1603_v2  ;;  %1238 = vset.pattern.permute.xlu2 %v1604_v3  ;;  %v648_v5 = vld [vmem:[%s515_s23] sm:$0xf]  ;;  %v1871_v8 = vld [vmem:[#allocation14] sm:$0xf]  ;;  %vm672_vm0 = vcmask 23552   ;;  %v1606_v13 = vmov 4.0  }
  0x57   : > { %676 = vperm.xlu1 %1234, %v663_v4   ;;  %v1867_v7 = vadd.f32 %v651_v6, %v648_v5  ;;  %1244 = vrcp.f32 %v1606_v13  ;;  %vm694_vm1 = vcmask 1022976   ;;  %vm708_vm2 = vcmask 1043456   ;;  %s1113_s21 = sshll.u32 %s1588_s12, 2  ;;  %s1976_s20 = sld [smem:[#allocation35_spill]] }
  0x58   : > { %v1607_v61 = vmov 3   ;;  %v1608_v62 = vmov 4   ;;  %vm772_vm7 = vcmask 31744   ;;  %s635_s22 = scalar_lea.vmem [#allocation16], %s1834_s14  ;;  %s853_s16 = scalar_lea.sflag [#allocation4], %s1831_s26 }
  0x59   : > { %687 = vrot.lane.b32.xlu2 %v1867_v7, %s1605_s15  ;;  %s866_s9 = sshll.u32 %s635_s22, 4  ;;  %s867_s9 = int_to_ptr.vmem [resolvable:$true] %s866_s9 }
  0x5d   : > { %669 = vrot.lane.b32.xlu0 %v1867_v7, %s1601_s24  ;;  %v1245_v20 = vpop.eup %1244  ;;  %s864_s28 = scalar_lea.hbm %s1976_s20, %s1113_s21  ;;  %s1514_s14 = scalar_lea.hbm %s1976_s20, 8 }
  0x5e   : > { %v717_v24 = vmul.f32 4.0, %v1245_v20  ;;  %vm721_vm3 = vweird.f32 %v1245_v20  ;;  %s868_s30 = sshll.u32 %s864_s28, 4  ;;  %s869_s30 = int_to_ptr.hbm [resolvable:$true] %s868_s30 }
  0x5f   : > { %1235 = vset.pattern.permute.xlu1 %v1604_v3  ;;  %s1508_s18 = sshra.s32 %s869_s30, 4  ;;  %s1509_s18 = int_to_ptr.hbm [resolvable:$true] %s1508_s18 }
  0x60   : > { %682 = vperm.xlu1 %1235, %v663_v4   ;;  %v718_v28 = vsub.f32 1.0, %v717_v24  ;;  %s1510_s12 = scalar_lea.hbm %s1509_s18, 4  ;;  %p1515_p11 = scmp.lt.s32.totalorder %s1509_s18, %s1976_s20 }
  0x61   : > { %691 = vrot.lane.b32.xlu2 %v1600_v0, %s1605_s15  ;;  %p1511_p3 = scmp.ne.s32.totalorder %s1509_s18, %s1510_s12  ;;  %p1516_p12 = scmp.lt.s32.totalorder %s1514_s14, %s1510_s12 }
  0x62   : > { %v719_v33 = vmul.f32 %v1245_v20, %v718_v28 }
  0x63   : > { %p1512_p7 = pnand %p1511_p3, %p1712_p8  ;;  %p1517_p0 = por %p1516_p12, %p1515_p11 }
  0x64   : > { %v720_v38 = vadd.f32 %v1245_v20, %v719_v33 }
  0x65   : > { %697 = vperm.xlu0 %1236, %v663_v4   ;;  %p1513_p10 = pneg %p1512_p7 }
  0x66   : > { %v1879_v43 = vsel %vm721_vm3, %v1245_v20, %v720_v38 }
  0x67   : > { %p1518_p1 = pnand %p1517_p0, %p1513_p10 }
  0x68   : > { %1237 = vset.pattern.permute.xlu1 %v1602_v1  ;;  %v1609_v1 = vmov 5  }
  0x69   : > { %704 = vperm.xlu1 %1237, %v1871_v8   ;;  %749 = vperm.xlu2 %1238, %v1871_v8  }
  0x6d   : > { %1241 = vset.pattern.permute.xlu0 %v1608_v62 }
  0x6e   : > { %832 = vperm.xlu0 %1241, %v1871_v8  }
  0x71   : > { %1239 = vset.pattern.permute.xlu1 %v1603_v2  ;;  %1240 = vset.pattern.permute.xlu2 %v1607_v61 }
  0x72   : > { %754 = vperm.xlu1 %1239, %v1871_v8   ;;  %769 = vperm.xlu2 %1240, %v1871_v8  }
  0x76   : > { %1243 = vset.pattern.permute.xlu0 %v1609_v1 }
  0x7a   : > { %1242 = vset.pattern.permute.xlu1 %v1609_v1 }
  0x7b   : > { %837 = vperm.xlu1 %1242, %v1871_v8  }
  0xb3   : > { %v688_v10 = vpop.permute.xlu2 %687 }
  0xbb   : > { %v692_v15 = vpop.permute.xlu2 %691 }
  0xbc   : > { %v695_v21 = vsel %vm694_vm1, %v688_v10, %v692_v15  ;;  %v767_v15 = vld [vmem:[#allocation13] sm:$0xf] }
  0xc3   : > { %v750_v59 = vpop.permute.xlu2 %749 }
  0xc7   : > { %v666_v9 = vpop.permute.xlu0 %665 }
  0xc9   : > { %v677_v11 = vpop.permute.xlu1 %676 }
  0xcf   : > { %v670_v12 = vpop.permute.xlu0 %669 }
  0xd0   : > { %v673_v14 = vsel %vm672_vm0, %v666_v9, %v670_v12 }
  0xd1   : > { %v679_v19 = vmul.f32 %v677_v11, %v673_v14 }
  0xd2   : > { %v683_v16 = vpop.permute.xlu1 %682 }
  0xd3   : > { %v685_v17 = vmul.f32 %v683_v16, %v1867_v7  ;;  %v770_v16 = vpop.permute.xlu2 %769 }
  0xd5   : > { %v686_v22 = vadd.f32 %v685_v17, %v679_v19 }
  0xd7   : > { %v698_v18 = vpop.permute.xlu0 %697 }
  0xd8   : > { %v700_v23 = vmul.f32 %v698_v18, %v695_v21 }
  0xda   : > { %v701_v25 = vadd.f32 %v700_v23, %v686_v22 }
  0xdb   : > { %v705_v26 = vpop.permute.xlu1 %704 }
  0xdc   : > { %v707_v27 = vadd.f32 %v705_v26, %v701_v25 }
  0xde   : > { %v709_v29 = vsel %vm708_vm2, %v707_v27, 0.0  ;;  %v724_v30 = vmul.f32 %v707_v27, %v707_v27 }
  0xdf   : > { %v710_v31 = vrot.slane %v709_v29, 4 }
  0xe0   : > { %v725_v32 = vsel %vm708_vm2, %v724_v30, 0.0 }
  0xe1   : > { %v711_v34 = vadd.f32 %v710_v31, %v709_v29  ;;  %v726_v35 = vrot.slane %v725_v32, 4 }
  0xe3   : > { %v712_v36 = vrot.slane %v711_v34, 2  ;;  %v727_v37 = vadd.f32 %v726_v35, %v725_v32 }
  0xe4   : > { %v755_v0 = vpop.permute.xlu1 %754 }
  0xe5   : > { %v713_v39 = vadd.f32 %v712_v36, %v711_v34  ;;  %v728_v40 = vrot.slane %v727_v37, 2 }
  0xe7   : > { %v714_v41 = vrot.slane %v713_v39, 1  ;;  %v729_v42 = vadd.f32 %v728_v40, %v727_v37 }
  0xe9   : > { %v730_v44 = vrot.slane %v729_v42, 1  ;;  %v715_v45 = vadd.f32 %v714_v41, %v713_v39 }
  0xeb   : > { %v731_v46 = vadd.f32 %v730_v44, %v729_v42  ;;  %v723_v47 = vmul.f32 %v1879_v43, %v715_v45 }
  0xed   : > { %v732_v48 = vmul.f32 %v731_v46, %v1879_v43  ;;  %v733_v49 = vmul.f32 %v723_v47, %v723_v47  ;;  %v746_v58 = vsub.f32 %v707_v27, %v723_v47  ;;  %v833_v46 = vpop.permute.xlu0 %832 }
  0xef   : > { %v734_v50 = vsub.f32 %v732_v48, %v733_v49 }
  0xf1   : > { %v735_v51 = vadd.f32 1e-05, %v734_v50 }
  0xf3   : > { %1246 = vrsqrt.f32 %v735_v51  ;;  %vm742_vm5 = vweird.f32 %v735_v51 }
  0xf9   : > { %v1247_v52 = vpop.eup %1246 }
  0xfa   : > { %v737_v53 = vmul.f32 %v1247_v52, %v735_v51  ;;  %vm743_vm4 = vweird.f32 %v1247_v52 }
  0xfb   : > { %vm744_vm6 = vmor %vm742_vm5, %vm743_vm4 }
  0xfc   : > { %v738_v54 = vmul.f32 %v1247_v52, %v737_v53 }
  0xfe   : > { %v739_v55 = vmul.f32 0.5, %v738_v54 }
 0x100   : > { %v740_v56 = vsub.f32 1.5, %v739_v55 }
 0x102   : > { %v741_v57 = vmul.f32 %v1247_v52, %v740_v56 }
 0x104   : > { %v745_v60 = vsel %vm744_vm6, %v1247_v52, %v741_v57 }
 0x105   : > { %v747_v63 = vmul.f32 %v746_v58, %v745_v60 }
 0x107   : > { %v752_v2 = vmul.f32 %v750_v59, %v747_v63 }
 0x109   : > { %v757_v3 = vadd.f32 %v755_v0, %v752_v2 }
 0x10b   : > { %v758_v4 = vmul.f32 %v757_v3, %v757_v3 }
 0x10d   : > { %v759_v5 = vmul.f32 %v758_v4, %v757_v3 }
 0x10f   : > { %v760_v6 = vmul.f32 0.044715, %v759_v5 }
 0x111   : > { %v761_v9 = vadd.f32 %v760_v6, %v757_v3 }
 0x113   : > { %v762_v10 = vmul.f32 0.7978846, %v761_v9 }
 0x115   : > { %1248 = vtanh.f32 %v762_v10 }
 0x11b   : > { %v1249_v11 = vpop.eup %1248 }
 0x11c   : > { %v764_v12 = vadd.f32 1.0, %v1249_v11 }
 0x11e   : > { %v765_v13 = vmul.f32 0.5, %v764_v12 }
 0x120   : > { %v766_v14 = vmul.f32 %v765_v13, %v757_v3 }
 0x122   : > { %1110 = vmatpush.msk.msra.mxu0 %vm708_vm2, %v766_v14 }
 0x123   : > { %1111 = vmatmul.msk.f32.vlgmr.msra.gmra.mxu0 %vm772_vm7, %v767_v15 }
 0x1a0   : > { %v796_v17 = vpop.f32.mrf.mxu0 }
 0x1a1   : > { %v797_v8 = vadd.f32 %v796_v17, %v770_v16 }
 0x1a3   : > { %v799_v18 = vsel %vm708_vm2, %v797_v8, 0.0  ;;  %v807_v19 = vmul.f32 %v797_v8, %v797_v8 }
 0x1a4   : > { %v800_v20 = vrot.slane %v799_v18, 4 }
 0x1a5   : > { %v808_v21 = vsel %vm708_vm2, %v807_v19, 0.0 }
 0x1a6   : > { %v801_v22 = vadd.f32 %v800_v20, %v799_v18  ;;  %v809_v23 = vrot.slane %v808_v21, 4 }
 0x1a8   : > { %v802_v24 = vrot.slane %v801_v22, 2  ;;  %v810_v25 = vadd.f32 %v809_v23, %v808_v21 }
 0x1aa   : > { %v803_v26 = vadd.f32 %v802_v24, %v801_v22  ;;  %v811_v27 = vrot.slane %v810_v25, 2 }
 0x1ac   : > { %v804_v28 = vrot.slane %v803_v26, 1  ;;  %v812_v29 = vadd.f32 %v811_v27, %v810_v25 }
 0x1ae   : > { %v813_v30 = vrot.slane %v812_v29, 1  ;;  %v805_v31 = vadd.f32 %v804_v28, %v803_v26 }
 0x1b0   : > { %v814_v32 = vadd.f32 %v813_v30, %v812_v29  ;;  %v806_v33 = vmul.f32 %v805_v31, %v1879_v43 }
 0x1b2   : > { %v815_v34 = vmul.f32 %v814_v32, %v1879_v43  ;;  %v816_v35 = vmul.f32 %v806_v33, %v806_v33  ;;  %v829_v45 = vsub.f32 %v797_v8, %v806_v33  ;;  %v838_v43 = vpop.permute.xlu1 %837 }
 0x1b4   : > { %v817_v36 = vsub.f32 %v815_v34, %v816_v35 }
 0x1b6   : > { %v818_v37 = vadd.f32 1e-05, %v817_v36 }
 0x1b8   : > { %1250 = vrsqrt.f32 %v818_v37  ;;  %vm825_vm9 = vweird.f32 %v818_v37 }
 0x1be   : > { %v1251_v38 = vpop.eup %1250 }
 0x1bf   : > { %v820_v39 = vmul.f32 %v1251_v38, %v818_v37  ;;  %vm826_vm8 = vweird.f32 %v1251_v38 }
 0x1c0   : > { %vm827_vm10 = vmor %vm825_vm9, %vm826_vm8 }
 0x1c1   : > { %v821_v40 = vmul.f32 %v1251_v38, %v820_v39 }
 0x1c3   : > { %v822_v41 = vmul.f32 0.5, %v821_v40 }
 0x1c5   : > { %v823_v42 = vsub.f32 1.5, %v822_v41 }
 0x1c7   : > { %v824_v44 = vmul.f32 %v1251_v38, %v823_v42 }
 0x1c9   : > { %v828_v47 = vsel %vm827_vm10, %v1251_v38, %v824_v44 }
 0x1ca   : > { %v830_v48 = vmul.f32 %v829_v45, %v828_v47 }
 0x1cc   : > { %v835_v49 = vmul.f32 %v833_v46, %v830_v48 }
 0x1ce   : > { %v840_v50 = vadd.f32 %v838_v43, %v835_v49 }
 0x1d0   : > { %v841_v51 = vmul.f32 %v840_v50, %v840_v50 }
 0x1d2   : > { %v842_v52 = vmul.f32 %v841_v51, %v840_v50 }
 0x1d4   : > { %v843_v53 = vmul.f32 0.044715, %v842_v52 }
 0x1d6   : > { %v844_v54 = vadd.f32 %v843_v53, %v840_v50 }
 0x1d8   : > { %v845_v55 = vmul.f32 0.7978846, %v844_v54 }
 0x1da   : > { %1252 = vtanh.f32 %v845_v55 }
 0x1e0   : > { %v1253_v56 = vpop.eup %1252 }
 0x1e1   : > { %v847_v57 = vadd.f32 1.0, %v1253_v56 }
 0x1e3   : > { %v848_v58 = vmul.f32 0.5, %v847_v57 }
 0x1e5   : > { %v849_v59 = vmul.f32 %v848_v58, %v840_v50 }
 0x1e7   : > { %v850_v60 = vadd.f32 %v849_v59, %v1867_v7 }
 0x1e9   : > { %851 = vst [vmem:[%s635_s22] sm:$0xf] %v850_v60 }
 0x1ea   : > { %1521 = shalt.err (!%p1518_p1)
}
 0x1eb   : > { %1136 = dma.vmem_to_hbm [thread:$0]  (%p1712_p8), %s867_s9, 64, %s869_s30, %s853_s16  }
 0x1ec PF: > { %s1978_s26 = sld [smem:[#allocation24_spill]]  ;;  %p1165_p2 = pnand %p1087_p13, %p1716_p9 }
 0x1ed   : > { %s1980_s29 = sld [smem:[#allocation26_spill]] }
 0x1ee   : > { %p1166_p4 = pneg %p1165_p2 }
 0x1f2   : > { %s880_s24 = sand.u32 1, %s1978_s26  }
 0x1f3   : > { %s881_s19 = scalar_lea.sflag [#allocation4], %s880_s24 }
 0x1f4   : > { %1571 = dma.done.wait (%p1166_p4), %s881_s19, 64  }
 0x1f5   : > { %1573 = vsyncadd (%p1166_p4), %s881_s19, 4294967232  ;;  %s35_s14 = sadd.s32 1, %s1980_s29   ;;  %s1981_s27 = sld [smem:[#allocation30_spill]] }
 0x1f6   : > { %p32_p6 = scmp.ge.s32.totalorder %s35_s14, 4   ;;  %s1982_s12 = sld [smem:[#allocation25_spill]] }
 0x1f7   : > { %s1983_s13 = sld [smem:[#allocation29_spill]]  ;;  %s1984_s30 = smov %s1580_s10 }
 0x1f8   : > { %s1985_s10 = smov %s1584_s11  ;;  %34 = sbr.rel (!%p32_p6) target bundleno = 19 (0x13), region = 170 }
 0x1fb   : > { %s1986_s11 = smov %s1981_s27 }
 0x1fd   :  { %887 = vsyncpa [#allocation3], 1 }
 0x1fe   :  { %889 = vsyncpa [#allocation3 + $0x1], 1 }
 0x1ff   :  { %890 = vsyncpa [#allocation6], 1 }
 0x200   :  { %892 = vsyncpa [#allocation6 + $0x1], 1 }
 0x201   :  { %893 = vsyncpa [#allocation9], 1 }
 0x202   :  { %895 = vsyncpa [#allocation9 + $0x1], 1 }
 0x203   :  { %896 = vsyncpa [#allocation12], 1 }
 0x204   :  { %898 = vsyncpa [#allocation12 + $0x1], 1 }
 0x205   :  { %899 = vsyncpa [#allocation15], 1 }
 0x206   :  { %900 = vsyncpa [#allocation4], 1 }
 0x207   :  { %902 = vsyncpa [#allocation4 + $0x1], 1 }

</bundles_post_ra>
